<compile_context>
chip_gen: v5e
topology: v5e:2x2
jax: 0.10.0
libtpu: 0.0.40
codegen_flags: <defaults>
</compile_context>

<pallas_src>
import jax
import jax.numpy as jnp
from jax.experimental import pallas as pl
from jax.experimental.pallas import tpu as pltpu


def _round_up(n, m):
    return ((n + m - 1) // m) * m


def encoder_kernel(x_ref, w1_ref, b1_ref, w2_ref, b2_ref, wmv_ref, bmv_ref, out_ref):
    # Cast x in-kernel (free VPU cast on the VMEM tile) -> no wrapper HBM copy.
    x = x_ref[...].astype(w1_ref.dtype)

    # fc1 + ReLU  (MXU accumulates in f32; bias-add / ReLU stay f32 on the VPU)
    h = jnp.dot(x, w1_ref[...], preferred_element_type=jnp.float32)
    h = jnp.maximum(h + b1_ref[...], 0.0)

    # fc2 + ReLU
    h = jnp.dot(h.astype(w2_ref.dtype), w2_ref[...], preferred_element_type=jnp.float32)
    h = jnp.maximum(h + b2_ref[...], 0.0)

    # merged heads: [mean | logvar] in one matmul and one (lane-denser) store
    out = jnp.dot(h.astype(wmv_ref.dtype), wmv_ref[...],
                  preferred_element_type=jnp.float32)
    out_ref[...] = (out + bmv_ref[...]).astype(out_ref.dtype)


def encoder_forward(x, params, *, compute_dtype=jnp.float32, tile_batch=4096):
    """x: (B, input_dim). params: weights stored (in, out), biases (1, out).

    Returns (mean, logvar), each (B, latent_dim) float32.

    compute_dtype: dtype of the (tiny, VMEM-resident) weights and of the in-kernel
    matmul operands.  bf16 halves MXU passes (and halves x HBM traffic if the
    caller already supplies bf16 x); accumulation / bias / ReLU are always f32.
    """
    B, input_dim = x.shape
    h1 = params["w1"].shape[1]
    h2 = params["w2"].shape[1]
    latent_dim = params["wm"].shape[1]
    out_dim = 2 * latent_dim

    # --- batch-lane packing factor ------------------------------------------
    # Pack `pack` batch rows along the 128-lane axis.  Choose the largest pack
    # that keeps B a multiple of 8*pack, so we never introduce a padding copy.
    B8 = _round_up(B, 8)
    max_pack = max(1, 128 // max(input_dim, 1))
    pack = 1
    for p in range(max_pack, 0, -1):
        if B8 % (8 * p) == 0:
            pack = p
            break

    xw = x
    if B8 != B:  # rare: only when B % 8 != 0 (at most 7 padded rows)
        xw = jnp.pad(xw, ((0, B8 - B), (0, 0)))
    Bp = B8 // pack
    # Row-major-compatible reshape -> bitcast, no HBM copy.
    xp = xw.reshape(Bp, pack * input_dim)

    # --- pack weights block-diagonally (tiny, one-off) ------------------------
    eye = jnp.eye(pack, dtype=jnp.float32)
    wmv_flat = jnp.concatenate([params["wm"], params["wv"]], axis=1)
    bmv_flat = jnp.concatenate([params["bm"], params["bv"]], axis=1)
    w1 = jnp.kron(eye, params["w1"]).astype(compute_dtype)        # (pack*D,  pack*h1)
    w2 = jnp.kron(eye, params["w2"]).astype(compute_dtype)        # (pack*h1, pack*h2)
    wmv = jnp.kron(eye, wmv_flat).astype(compute_dtype)           # (pack*h2, pack*2L)
    b1 = jnp.tile(params["b1"].astype(jnp.float32), (1, pack))
    b2 = jnp.tile(params["b2"].astype(jnp.float32), (1, pack))
    bmv = jnp.tile(bmv_flat.astype(jnp.float32), (1, pack))

    # --- batch tiling ----------------------------------------------------------
    # TBp = packed rows per grid step (multiple of 8).  Ragged last block is
    # handled by Pallas (masked writeback), no padding copy needed.
    TBp = min(_round_up(max(tile_batch // pack, 8), 8), Bp)
    grid = (pl.cdiv(Bp, TBp),)

    # --- VMEM budget (2x-buffered x / out tiles + intermediates + weights) ----
    x_item = xp.dtype.itemsize
    tile_bytes = 2 * TBp * (pack * input_dim * x_item + pack * out_dim * 4)
    inter_bytes = TBp * pack * (h1 + h2) * 4
    weight_bytes = sum(int(a.size) * a.dtype.itemsize
                       for a in (w1, b1, w2, b2, wmv, bmv))
    vmem_limit = int(min(max(2 * (tile_bytes + inter_bytes + weight_bytes),
                             16 * 1024 * 1024), 32 * 1024 * 1024))

    resident = lambda shape: pl.BlockSpec(shape, lambda i: (0, 0))

    out = pl.pallas_call(
        encoder_kernel,
        out_shape=jax.ShapeDtypeStruct((Bp, pack * out_dim), jnp.float32),
        grid=grid,
        in_specs=[
            pl.BlockSpec((TBp, pack * input_dim), lambda i: (i, 0)),  # x: batch-tiled
            resident(w1.shape), resident(b1.shape),                   # weights resident
            resident(w2.shape), resident(b2.shape),
            resident(wmv.shape), resident(bmv.shape),
        ],
        out_specs=pl.BlockSpec((TBp, pack * out_dim), lambda i: (i, 0)),
        compiler_params=pltpu.CompilerParams(
            dimension_semantics=("parallel",),
            vmem_limit_bytes=vmem_limit,
        ),
    )(xp, w1, b1, w2, b2, wmv, bmv)

    # Un-pack (free bitcast reshape), drop pad rows, split merged heads.
    out = out.reshape(B8, out_dim)[:B]
    return out[:, :latent_dim], out[:, latent_dim:]


def init_params(key, input_dim, latent_dim):
    """Deterministic synthetic init matching nn.Linear shapes (stored transposed)."""
    ks = jax.random.split(key, 8)

    def linear(kw, kb, fan_in, fan_out):
        bound = 1.0 / jnp.sqrt(fan_in)
        w = jax.random.uniform(kw, (fan_in, fan_out), jnp.float32, -bound, bound)
        b = jax.random.uniform(kb, (1, fan_out), jnp.float32, -bound, bound)
        return w, b

    w1, b1 = linear(ks[0], ks[1], input_dim, 16)
    w2, b2 = linear(ks[2], ks[3], 16, 8)
    wm, bm = linear(ks[4], ks[5], 8, latent_dim)
    wv, bv = linear(ks[6], ks[7], 8, latent_dim)
    return dict(w1=w1, b1=b1, w2=w2, b2=b2, wm=wm, bm=bm, wv=wv, bv=bv)


def encoder_ref(x, p):
    """Pure-JAX reference for correctness check."""
    h = jax.nn.relu(x @ p["w1"] + p["b1"])
    h = jax.nn.relu(h @ p["w2"] + p["b2"])
    return h @ p["wm"] + p["bm"], h @ p["wv"] + p["bv"]


if __name__ == "__main__":
    key = jax.random.PRNGKey(0)
    k_x, k_p = jax.random.split(key)

    batch, input_dim, latent_dim = 8, 32, 4
    x = jax.random.normal(k_x, (batch, input_dim), jnp.float32)
    params = init_params(k_p, input_dim, latent_dim)
    mean_r, logvar_r = encoder_ref(x, params)

    # f32 path (small batch, pack=1) — exact match to the reference.
    mean, logvar = encoder_forward(x, params, compute_dtype=jnp.float32)
    jax.block_until_ready((mean, logvar))
    assert mean.shape == (batch, latent_dim) and logvar.shape == (batch, latent_dim)
    assert jnp.allclose(mean, mean_r, atol=1e-5, rtol=1e-5)
    assert jnp.allclose(logvar, logvar_r, atol=1e-5, rtol=1e-5)

    # bf16-compute path (MXU / bandwidth optimization) — looser tolerance.
    mean_bf, logvar_bf = encoder_forward(x, params, compute_dtype=jnp.bfloat16)
    jax.block_until_ready((mean_bf, logvar_bf))
    assert jnp.allclose(mean_bf, mean_r, atol=5e-2, rtol=5e-2)
    assert jnp.allclose(logvar_bf, logvar_r, atol=5e-2, rtol=5e-2)

    # Batch multiple of 32 — exercises the batch-lane packing path (pack=4).
    x_pk = jax.random.normal(k_x, (256, input_dim), jnp.float32)
    mean_p, logvar_p = encoder_forward(x_pk, params, compute_dtype=jnp.float32)
    jax.block_until_ready((mean_p, logvar_p))
    mr_p, lr_p = encoder_ref(x_pk, params)
    assert mean_p.shape == (256, latent_dim)
    assert jnp.allclose(mean_p, mr_p, atol=1e-5, rtol=1e-5)
    assert jnp.allclose(logvar_p, lr_p, atol=1e-5, rtol=1e-5)

    # Larger, non-tile-multiple batch — exercises the ragged-grid path (no pad copy).
    x_big = jax.random.normal(k_x, (1000, input_dim), jnp.float32)
    mean_b, logvar_b = encoder_forward(x_big, params,
                                       compute_dtype=jnp.float32, tile_batch=256)
    jax.block_until_ready((mean_b, logvar_b))
    mr, lr = encoder_ref(x_big, params)
    assert mean_b.shape == (1000, latent_dim)
    assert jnp.allclose(mean_b, mr, atol=1e-5, rtol=1e-5)
    assert jnp.allclose(logvar_b, lr, atol=1e-5, rtol=1e-5)

    print("KERNEL_OK")
</pallas_src>

<mosaic_0001>
module attributes {stable_mosaic.version = 11 : i64} {
  func.func @encoder_kernel(%arg0: i32, %arg1: memref<8x32xf32, #tpu.memory_space<vmem>>, %arg2: memref<32x16xf32, #tpu.memory_space<vmem>>, %arg3: memref<1x16xf32, #tpu.memory_space<vmem>>, %arg4: memref<16x8xf32, #tpu.memory_space<vmem>>, %arg5: memref<1x8xf32, #tpu.memory_space<vmem>>, %arg6: memref<8x8xf32, #tpu.memory_space<vmem>>, %arg7: memref<1x8xf32, #tpu.memory_space<vmem>>, %arg8: memref<8x8xf32, #tpu.memory_space<vmem>>) attributes {dimension_semantics = [#tpu.dimension_semantics<parallel>], iteration_bounds = array<i64: 1>, scalar_prefetch = 0 : i64, scratch_operands = 0 : i64, tpu.core_type = #tpu.core_type<tc>, window_params = [{transform_indices = @transform_0, window_bounds = array<i64: 8, 32>}, {pipeline_mode = #tpu.pipeline_mode<synchronous>, transform_indices = @transform_1, window_bounds = array<i64: 32, 16>}, {pipeline_mode = #tpu.pipeline_mode<synchronous>, transform_indices = @transform_2, window_bounds = array<i64: 1, 16>}, {pipeline_mode = #tpu.pipeline_mode<synchronous>, transform_indices = @transform_3, window_bounds = array<i64: 16, 8>}, {pipeline_mode = #tpu.pipeline_mode<synchronous>, transform_indices = @transform_4, window_bounds = array<i64: 1, 8>}, {pipeline_mode = #tpu.pipeline_mode<synchronous>, transform_indices = @transform_5, window_bounds = array<i64: 8, 8>}, {pipeline_mode = #tpu.pipeline_mode<synchronous>, transform_indices = @transform_6, window_bounds = array<i64: 1, 8>}, {transform_indices = @transform_7, window_bounds = array<i64: 8, 8>}]} {
    %c0 = arith.constant 0 : index
    %c0_0 = arith.constant 0 : index
    %0 = vector.load %arg1[%c0, %c0_0] : memref<8x32xf32, #tpu.memory_space<vmem>>, vector<8x32xf32>
    %c0_1 = arith.constant 0 : index
    %c0_2 = arith.constant 0 : index
    %1 = vector.load %arg2[%c0_1, %c0_2] : memref<32x16xf32, #tpu.memory_space<vmem>>, vector<32x16xf32>
    %cst = arith.constant dense<0.000000e+00> : vector<8x16xf32>
    %2 = tpu.matmul %0, %1, %cst {dimension_numbers = #tpu.dot_dimension_numbers<[1], [0], [0], [1], [0, 0, 1, 1], [], []>} : vector<8x32xf32>, vector<32x16xf32>, vector<8x16xf32> -> vector<8x16xf32>
    %c0_3 = arith.constant 0 : index
    %c0_4 = arith.constant 0 : index
    %3 = vector.load %arg3[%c0_3, %c0_4] : memref<1x16xf32, #tpu.memory_space<vmem>>, vector<1x16xf32>
    %4 = vector.broadcast %3 : vector<1x16xf32> to vector<8x16xf32>
    %5 = arith.addf %2, %4 : vector<8x16xf32>
    %cst_5 = arith.constant 0.000000e+00 : f32
    %6 = vector.broadcast %cst_5 : f32 to vector<8x16xf32>
    %7 = arith.maximumf %5, %6 : vector<8x16xf32>
    %c0_6 = arith.constant 0 : index
    %c0_7 = arith.constant 0 : index
    %8 = vector.load %arg4[%c0_6, %c0_7] : memref<16x8xf32, #tpu.memory_space<vmem>>, vector<16x8xf32>
    %cst_8 = arith.constant dense<0.000000e+00> : vector<8x8xf32>
    %9 = tpu.matmul %7, %8, %cst_8 {dimension_numbers = #tpu.dot_dimension_numbers<[1], [0], [0], [1], [0, 0, 1, 1], [], []>} : vector<8x16xf32>, vector<16x8xf32>, vector<8x8xf32> -> vector<8x8xf32>
    %c0_9 = arith.constant 0 : index
    %c0_10 = arith.constant 0 : index
    %10 = vector.load %arg5[%c0_9, %c0_10] : memref<1x8xf32, #tpu.memory_space<vmem>>, vector<1x8xf32>
    %11 = vector.broadcast %10 : vector<1x8xf32> to vector<8x8xf32>
    %12 = arith.addf %9, %11 : vector<8x8xf32>
    %cst_11 = arith.constant 0.000000e+00 : f32
    %13 = vector.broadcast %cst_11 : f32 to vector<8x8xf32>
    %14 = arith.maximumf %12, %13 : vector<8x8xf32>
    %c0_12 = arith.constant 0 : index
    %c0_13 = arith.constant 0 : index
    %15 = vector.load %arg6[%c0_12, %c0_13] : memref<8x8xf32, #tpu.memory_space<vmem>>, vector<8x8xf32>
    %cst_14 = arith.constant dense<0.000000e+00> : vector<8x8xf32>
    %16 = tpu.matmul %14, %15, %cst_14 {dimension_numbers = #tpu.dot_dimension_numbers<[1], [0], [0], [1], [0, 0, 1, 1], [], []>} : vector<8x8xf32>, vector<8x8xf32>, vector<8x8xf32> -> vector<8x8xf32>
    %c0_15 = arith.constant 0 : index
    %c0_16 = arith.constant 0 : index
    %17 = vector.load %arg7[%c0_15, %c0_16] : memref<1x8xf32, #tpu.memory_space<vmem>>, vector<1x8xf32>
    %18 = vector.broadcast %17 : vector<1x8xf32> to vector<8x8xf32>
    %19 = arith.addf %16, %18 : vector<8x8xf32>
    %c0_17 = arith.constant 0 : index
    %c0_18 = arith.constant 0 : index
    %20 = vector.load %arg8[%c0_17, %c0_18] : memref<8x8xf32, #tpu.memory_space<vmem>>, vector<8x8xf32>
    tpu.vector_store %arg8[%c0_17, %c0_18], %19 {strides = array<i32>} : memref<8x8xf32, #tpu.memory_space<vmem>>, vector<8x8xf32>,
    return
  }
  func.func @transform_0(%arg0: i32) -> (i32, i32) {
    %c0_i32 = arith.constant 0 : i32
    %c0_i32_0 = arith.constant 0 : i32
    return %arg0, %c0_i32 : i32, i32
  }
  func.func @transform_1(%arg0: i32) -> (i32, i32) {
    %c0_i32 = arith.constant 0 : i32
    %c0_i32_0 = arith.constant 0 : i32
    %c0_i32_1 = arith.constant 0 : i32
    return %c0_i32, %c0_i32_0 : i32, i32
  }
  func.func @transform_2(%arg0: i32) -> (i32, i32) {
    %c0_i32 = arith.constant 0 : i32
    %c0_i32_0 = arith.constant 0 : i32
    %c0_i32_1 = arith.constant 0 : i32
    return %c0_i32, %c0_i32_0 : i32, i32
  }
  func.func @transform_3(%arg0: i32) -> (i32, i32) {
    %c0_i32 = arith.constant 0 : i32
    %c0_i32_0 = arith.constant 0 : i32
    %c0_i32_1 = arith.constant 0 : i32
    return %c0_i32, %c0_i32_0 : i32, i32
  }
  func.func @transform_4(%arg0: i32) -> (i32, i32) {
    %c0_i32 = arith.constant 0 : i32
    %c0_i32_0 = arith.constant 0 : i32
    %c0_i32_1 = arith.constant 0 : i32
    return %c0_i32, %c0_i32_0 : i32, i32
  }
  func.func @transform_5(%arg0: i32) -> (i32, i32) {
    %c0_i32 = arith.constant 0 : i32
    %c0_i32_0 = arith.constant 0 : i32
    %c0_i32_1 = arith.constant 0 : i32
    return %c0_i32, %c0_i32_0 : i32, i32
  }
  func.func @transform_6(%arg0: i32) -> (i32, i32) {
    %c0_i32 = arith.constant 0 : i32
    %c0_i32_0 = arith.constant 0 : i32
    %c0_i32_1 = arith.constant 0 : i32
    return %c0_i32, %c0_i32_0 : i32, i32
  }
  func.func @transform_7(%arg0: i32) -> (i32, i32) {
    %c0_i32 = arith.constant 0 : i32
    %c0_i32_0 = arith.constant 0 : i32
    return %arg0, %c0_i32 : i32, i32
  }
}

</mosaic_0001>

<bundles_post_ra>
// kernel: tpu_custom_call.1
= control target key start
LH: loop header
LB: loop body
LE: loop exit
PB: predicated region body
PF: predicated region fallthrough
CT: control target
= control target key end

     0   :  { %s248_s0 = inlined_call_operand.vmem [shape: f32[8,32], index: 0, kind: input, shape index: {}]   ;;  %s249_s1 = inlined_call_operand.vmem [shape: f32[32,16], index: 1, kind: input, shape index: {}]   ;;  %s250_s2 = inlined_call_operand.vmem [shape: f32[1,16], index: 2, kind: input, shape index: {}]   ;;  %s251_s3 = inlined_call_operand.vmem [shape: f32[16,8], index: 3, kind: input, shape index: {}]   ;;  %s252_s4 = inlined_call_operand.vmem [shape: f32[1,8], index: 4, kind: input, shape index: {}]   ;;  %s253_s5 = inlined_call_operand.vmem [shape: f32[8,8], index: 5, kind: input, shape index: {}]   ;;  %s254_s6 = inlined_call_operand.vmem [shape: f32[1,8], index: 6, kind: input, shape index: {}]   ;;  %s255_s7 = inlined_call_operand.hbm [shape: f32[8,8], index: 7, kind: output, shape index: {}]  }
   0x1   :  { %v31_v0 = vld [vmem:[%s249_s1 + $0x18] sm:$0xff]  ;;  %v30_v1 = vld [vmem:[%s249_s1 + $0x10] sm:$0xff]  ;;  %v29_v2 = vld [vmem:[%s249_s1 + $0x8] sm:$0xff] }
   0x2   :  { %52 = vmatpush.msra.mxu0 %v31_v0 }
   0x4   :  { %53 = vmatpush.msra.mxu0 %v30_v1 }
   0x5   :  { %12 = vsyncpa [#allocation3], 0  ;;  %v28_v3 = vld [vmem:[%s249_s1] sm:$0xff]  ;;  %vm36_vm0 = vcmask 261120   ;;  %v62_v5 = vld [vmem:[%s251_s3 + $0x8] sm:$0xff]  ;;  %vm67_vm1 = vcmask 130048  }
   0x6   :  { %54 = vmatpush.msra.mxu0 %v29_v2  ;;  %v27_v4 = vld [vmem:[%s248_s0] sm:$0xff]  ;;  %85 = vmatpush.msra.mxu1 %v62_v5  ;;  %vm97_vm2 = vcmask 64512   ;;  %s171_s19 = smov [#allocation2]  }
   0x7   :  { %v61_v6 = vld [vmem:[%s251_s3] sm:$0xff]  ;;  %s127_s20 = sshll.u32 %s171_s19, 4  ;;  %s128_s20 = int_to_ptr.vmem [resolvable:$true] %s127_s20 }
   0x8   :  { %55 = vmatpush.msra.mxu0 %v28_v3  ;;  %86 = vmatpush.msra.mxu1 %v61_v6  ;;  %v142_v7 = vld [vmem:[%s250_s2] ss:$0 sm:$0xff] }
   0x9   :  { %138 = vmatmul.msk.f32.vlgmr.msra.gmra.mxu0 %vm36_vm0, %v27_v4  ;;  %v92_v11 = vld [vmem:[%s253_s5] sm:$0xff]  ;;  %s129_s5 = sshll.u32 %s255_s7, 4  ;;  %s130_s5 = int_to_ptr.hbm [resolvable:$true] %s129_s5 }
   0xa   :  { %116 = vmatpush.msra.mxu2 %v92_v11  ;;  %v143_v12 = vld [vmem:[%s252_s4] ss:$0 sm:$0xff] }
   0xb   :  { %v144_v16 = vld [vmem:[%s254_s6] ss:$0 sm:$0xff] }
  0x86   :  { %v57_v8 = vpop.f32.mrf.mxu0 }
  0x87   :  { %v58_v9 = vadd.f32 %v142_v7, %v57_v8 }
  0x89   :  { %v60_v10 = vmax.f32 %v58_v9, 0.0 }
  0x8b   :  { %139 = vmatmul.msk.f32.vlgmr.msra.gmra.mxu1 %vm67_vm1, %v60_v10 }
 0x108   :  { %v88_v13 = vpop.f32.mrf.mxu1 }
 0x109   :  { %v89_v14 = vadd.f32 %v143_v12, %v88_v13 }
 0x10b   :  { %v91_v15 = vmax.f32 %v89_v14, 0.0 }
 0x10d   :  { %140 = vmatmul.msk.f32.vlgmr.msra.gmra.mxu2 %vm97_vm2, %v91_v15 }
 0x190   :  { %v118_v17 = vpop.f32.mrf.mxu2 }
 0x191   :  { %v119_v18 = vadd.f32 %v144_v16, %v118_v17 }
 0x193   :  { %121 = vst.msk [vmem:[#allocation2] sm:$0xff] %vm97_vm2, %v119_v18 }
 0x194   :  { %132 = dma.vmem_to_hbm [thread:$0]  %s128_s20, 128, %s130_s5, [#allocation3]  }
 0x195   :  { %169 = dma.done.wait [#allocation3], 128  }
 0x196   :  { %170 = vsyncadd [#allocation3], 4294967168 }
 0x197   :  { %137 = vsyncpa [#allocation3], 1 }

</bundles_post_ra>
